<compile_context>
chip_gen: v5e
topology: v5e:2x2
jax: 0.10.0
libtpu: 0.0.40
codegen_flags: <defaults>
</compile_context>

<pallas_src>
import functools

import jax
import jax.numpy as jnp
import numpy as np
from jax import lax
from jax.experimental import pallas as pl
from jax.experimental.pallas import tpu as pltpu

EPS = 1e-12  # matches torch.nn.functional.normalize default eps

# dot_general dimension numbers
_NT = (((1,), (1,)), ((), ()))       # (M, C)   x (K, C)    -> (M, K)     == x @ W^T
_BTN = (((1,), (1,)), ((0,), (0,)))  # (B, N, K) x (B, N, C) -> (B, K, C) == a^T @ x per item


def _cdiv(a, b):
    return -(-a // b)


def _netvlad_kernel(x_ref, w_ref, b_ref, cent_ref, out_ref, *, n_valid):
    x3 = x_ref[...].astype(jnp.float32)       # (Bt, Np, C)
    w = w_ref[...].astype(jnp.float32)        # (K, C)
    b = b_ref[...].astype(jnp.float32)        # (1, K)
    cent = cent_ref[...].astype(jnp.float32)  # (K, C)

    bt, n_pad, c = x3.shape
    k = w.shape[0]

    # --- F.normalize(x, p=2, dim=0): per-item per-column L2 norm over N ------
    # Padded descriptor rows are zero, so they do not perturb the column norm.
    col_sumsq = jnp.sum(x3 * x3, axis=1, keepdims=True)              # (Bt, 1, C)
    x3 = x3 * lax.rsqrt(jnp.maximum(col_sumsq, EPS * EPS))

    # --- soft assignment: ONE big (Bt*Np, C) x (K, C)^T MXU contraction ------
    # Free reshape: Np % 8 == 0 (sublane), C % 128 == 0 (lane).
    x2 = x3.reshape(bt * n_pad, c)
    logits = lax.dot_general(x2, w, _NT,
                             preferred_element_type=jnp.float32) + b  # (Bt*Np, K)
    logits = logits - jnp.max(logits, axis=1, keepdims=True)
    e = jnp.exp(logits)
    a2 = e * pl.reciprocal(jnp.sum(e, axis=1, keepdims=True), approx=True)

    a3 = a2.reshape(bt, n_pad, k)                                     # (Bt, Np, K)
    if n_pad > n_valid:
        # Mask padded descriptor rows out of the soft assignment so they do
        # not contribute to atx / asum below.
        row = lax.broadcasted_iota(jnp.int32, (bt, n_pad, k), 1)
        a3 = jnp.where(row < n_valid, a3, 0.0)

    # --- vlad[b,k,c] = (a^T x)[b,k,c] - (sum_n a[b,n,k]) * cent[k,c] ---------
    atx = lax.dot_general(a3, x3, _BTN,
                          preferred_element_type=jnp.float32)         # (Bt, K, C)
    asum = jnp.sum(a3, axis=1)[:, :, None]                            # (Bt, K, 1)
    vlad = atx - asum * cent[None, :, :]                              # (Bt, K, C)

    # --- intra-normalization (over C) + global L2 of the flat descriptor ----
    row_sumsq = jnp.sum(vlad * vlad, axis=2, keepdims=True)           # (Bt, K, 1)
    inv_row = lax.rsqrt(jnp.maximum(row_sumsq, EPS * EPS))            # (Bt, K, 1)
    # sum of squares of the intra-normalized vlad, reusing row_sumsq
    g_sumsq = jnp.sum(row_sumsq * inv_row * inv_row,
                      axis=1, keepdims=True)                          # (Bt, 1, 1)
    inv_g = lax.rsqrt(jnp.maximum(g_sumsq, EPS * EPS))                # (Bt, 1, 1)

    out_ref[...] = (vlad * (inv_row * inv_g)).astype(out_ref.dtype)


def netvlad_forward_batched(x, fc_weight, fc_bias, centroids, *, block_b=128):
    """x: (B, N, C); fc_weight: (K, C); fc_bias: (K,); centroids: (K, C).
    Returns (B, K*C): each item processed independently (same as the module)."""
    B, N, C = x.shape
    K = fc_weight.shape[0]
    assert C == fc_weight.shape[1] == centroids.shape[1], "feature dim not correct"

    # Pad N to the f32 sublane multiple so the in-kernel reshape is free.
    n_pad = _cdiv(max(N, 8), 8) * 8

    # Even number of grid steps (v7x: 2 TCs share the 'parallel' axis evenly;
    # harmless on single-TC v5e/v6e), at most block_b items per step,
    # B padded so every block is full (no ragged final block).
    steps = max(1, _cdiv(B, block_b))
    if steps % 2:
        steps += 1
    bt = _cdiv(B, steps)
    b_pad = steps * bt

    xp = jnp.pad(x, ((0, b_pad - B), (0, n_pad - N), (0, 0)))
    bias2d = fc_bias.reshape(1, K)  # keep 2-D for a TPU-friendly layout

    vlad = pl.pallas_call(
        functools.partial(_netvlad_kernel, n_valid=N),
        out_shape=jax.ShapeDtypeStruct((b_pad, K, C), jnp.float32),
        grid=(steps,),
        in_specs=[
            pl.BlockSpec((bt, n_pad, C), lambda i: (i, 0, 0)),  # x block i
            pl.BlockSpec((K, C), lambda i: (0, 0)),             # fc weight (shared)
            pl.BlockSpec((1, K), lambda i: (0, 0)),             # fc bias   (shared)
            pl.BlockSpec((K, C), lambda i: (0, 0)),             # centroids (shared)
        ],
        out_specs=pl.BlockSpec((bt, K, C), lambda i: (i, 0, 0)),
        compiler_params=pltpu.CompilerParams(
            dimension_semantics=("parallel",)),
    )(xp, fc_weight, bias2d, centroids)

    # Drop padded batch items and flatten outside the kernel
    # (kernel output stays lane-dense (K, 128)).
    return vlad[:B].reshape(B, K * C)


def netvlad_forward(x, fc_weight, fc_bias, centroids):
    """Single-item path matching the PyTorch module: x (N, C) -> (1, K*C)."""
    return netvlad_forward_batched(x[None], fc_weight, fc_bias, centroids)


def init_params(key, num_clusters=8, dim=128):
    """Mirrors the PyTorch init: xavier_normal_ fc.weight, zero bias,
    uniform[0,1) centroids."""
    k_w, k_c = jax.random.split(key)
    std = (2.0 / (dim + num_clusters)) ** 0.5  # xavier normal, gain=1
    fc_weight = std * jax.random.normal(k_w, (num_clusters, dim), jnp.float32)
    fc_bias = jnp.zeros((num_clusters,), jnp.float32)
    centroids = jax.random.uniform(k_c, (num_clusters, dim), jnp.float32)
    return fc_weight, fc_bias, centroids


def _netvlad_ref_np(x, fc_w, fc_b, cent, eps=EPS):
    """float64 numpy reference mirroring the PyTorch forward."""
    x = x / np.maximum(np.linalg.norm(x, axis=0, keepdims=True), eps)
    logits = x @ fc_w.T + fc_b
    logits = logits - logits.max(axis=1, keepdims=True)
    e = np.exp(logits)
    a = e / e.sum(axis=1, keepdims=True)                        # (N, K)
    vlad = a.T @ x - a.sum(axis=0)[:, None] * cent              # (K, C)
    vlad = vlad / np.maximum(
        np.linalg.norm(vlad, axis=1, keepdims=True), eps)
    flat = vlad.reshape(-1)
    flat = flat / max(np.linalg.norm(flat), eps)
    return flat


if __name__ == "__main__":
    num_clusters, dim, N, B = 8, 128, 10, 3  # module defaults; x is (10, 128)

    key = jax.random.PRNGKey(0)
    k_x, k_p = jax.random.split(key)
    x = jax.random.normal(k_x, (B, N, dim), jnp.float32)
    fc_weight, fc_bias, centroids = init_params(k_p, num_clusters, dim)
    # use a non-zero bias so the bias-add path is exercised by the check
    fc_bias = 0.1 * jax.random.normal(jax.random.PRNGKey(1),
                                      (num_clusters,), jnp.float32)

    # batched path (even grid over padded B, 'parallel', N padded+masked)
    out = netvlad_forward_batched(x, fc_weight, fc_bias, centroids)
    jax.block_until_ready(out)
    assert out.shape == (B, num_clusters * dim)

    # single-item path matching the PyTorch module signature
    single = netvlad_forward(x[0], fc_weight, fc_bias, centroids)
    jax.block_until_ready(single)
    assert single.shape == (1, num_clusters * dim)

    # correctness check against a float64 reference (loose tolerance to allow
    # MXU f32 accumulation and the approx EUP reciprocal in the softmax)
    ref = np.stack([
        _netvlad_ref_np(np.asarray(x[i], np.float64),
                        np.asarray(fc_weight, np.float64),
                        np.asarray(fc_bias, np.float64),
                        np.asarray(centroids, np.float64))
        for i in range(B)
    ])
    np.testing.assert_allclose(np.asarray(out), ref, rtol=2e-2, atol=2e-3)
    np.testing.assert_allclose(np.asarray(single)[0], ref[0],
                               rtol=2e-2, atol=2e-3)

    print("KERNEL_OK")
</pallas_src>

<mosaic_0001>
module attributes {stable_mosaic.version = 11 : i64} {
  func.func @_netvlad_kernel(%arg0: i32, %arg1: memref<2x16x128xf32, #tpu.memory_space<vmem>>, %arg2: memref<8x128xf32, #tpu.memory_space<vmem>>, %arg3: memref<1x8xf32, #tpu.memory_space<vmem>>, %arg4: memref<8x128xf32, #tpu.memory_space<vmem>>, %arg5: memref<2x8x128xf32, #tpu.memory_space<vmem>>) attributes {dimension_semantics = [#tpu.dimension_semantics<parallel>], iteration_bounds = array<i64: 2>, scalar_prefetch = 0 : i64, scratch_operands = 0 : i64, tpu.core_type = #tpu.core_type<tc>, window_params = [{transform_indices = @transform_0, window_bounds = array<i64: 2, 16, 128>}, {pipeline_mode = #tpu.pipeline_mode<synchronous>, transform_indices = @transform_1, window_bounds = array<i64: 8, 128>}, {pipeline_mode = #tpu.pipeline_mode<synchronous>, transform_indices = @transform_2, window_bounds = array<i64: 1, 8>}, {pipeline_mode = #tpu.pipeline_mode<synchronous>, transform_indices = @transform_3, window_bounds = array<i64: 8, 128>}, {transform_indices = @transform_4, window_bounds = array<i64: 2, 8, 128>}]} {
    %c0 = arith.constant 0 : index
    %c0_0 = arith.constant 0 : index
    %c0_1 = arith.constant 0 : index
    %0 = vector.load %arg1[%c0, %c0_0, %c0_1] : memref<2x16x128xf32, #tpu.memory_space<vmem>>, vector<2x16x128xf32>
    %c0_2 = arith.constant 0 : index
    %c0_3 = arith.constant 0 : index
    %1 = vector.load %arg2[%c0_2, %c0_3] : memref<8x128xf32, #tpu.memory_space<vmem>>, vector<8x128xf32>
    %c0_4 = arith.constant 0 : index
    %c0_5 = arith.constant 0 : index
    %2 = vector.load %arg3[%c0_4, %c0_5] : memref<1x8xf32, #tpu.memory_space<vmem>>, vector<1x8xf32>
    %c0_6 = arith.constant 0 : index
    %c0_7 = arith.constant 0 : index
    %3 = vector.load %arg4[%c0_6, %c0_7] : memref<8x128xf32, #tpu.memory_space<vmem>>, vector<8x128xf32>
    %4 = arith.mulf %0, %0 : vector<2x16x128xf32>
    %cst = arith.constant dense<0.000000e+00> : vector<2x128xf32>
    %5 = vector.multi_reduction <add>, %4, %cst [1] : vector<2x16x128xf32> to vector<2x128xf32>
    %6 = vector.shape_cast %5 : vector<2x128xf32> to vector<2x1x128xf32>
    %cst_8 = arith.constant 1.000000e-24 : f32
    %7 = vector.broadcast %cst_8 : f32 to vector<2x1x128xf32>
    %8 = arith.maximumf %6, %7 : vector<2x1x128xf32>
    %9 = math.rsqrt %8 : vector<2x1x128xf32>
    %10 = vector.broadcast %9 : vector<2x1x128xf32> to vector<2x16x128xf32>
    %11 = arith.mulf %0, %10 : vector<2x16x128xf32>
    %12 = vector.shape_cast %11 : vector<2x16x128xf32> to vector<32x128xf32>
    %cst_9 = arith.constant dense<0.000000e+00> : vector<32x8xf32>
    %13 = tpu.matmul %12, %1, %cst_9 {dimension_numbers = #tpu.dot_dimension_numbers<[1], [1], [0], [0], [0, 0, 1, 0], [], []>} : vector<32x128xf32>, vector<8x128xf32>, vector<32x8xf32> -> vector<32x8xf32>
    %14 = vector.broadcast %2 : vector<1x8xf32> to vector<32x8xf32>
    %15 = arith.addf %13, %14 : vector<32x8xf32>
    %cst_10 = arith.constant dense<0xFF800000> : vector<32xf32>
    %16 = vector.multi_reduction <maximumf>, %15, %cst_10 [1] : vector<32x8xf32> to vector<32xf32>
    %17 = vector.shape_cast %16 : vector<32xf32> to vector<32x1xf32>
    %18 = vector.broadcast %17 : vector<32x1xf32> to vector<32x8xf32>
    %19 = arith.subf %15, %18 : vector<32x8xf32>
    %20 = math.exp %19 : vector<32x8xf32>
    %cst_11 = arith.constant dense<0.000000e+00> : vector<32xf32>
    %21 = vector.multi_reduction <add>, %20, %cst_11 [1] : vector<32x8xf32> to vector<32xf32>
    %22 = vector.shape_cast %21 : vector<32xf32> to vector<32x1xf32>
    %23 = tpu.reciprocal %22 {approx = true} : vector<32x1xf32> -> vector<32x1xf32>
    %24 = vector.broadcast %23 : vector<32x1xf32> to vector<32x8xf32>
    %25 = arith.mulf %20, %24 : vector<32x8xf32>
    %26 = vector.shape_cast %25 : vector<32x8xf32> to vector<2x16x8xf32>
    %27 = tpu.iota {dimensions = array<i32: 1>} : vector<2x16x8xi32>
    %c10_i32 = arith.constant 10 : i32
    %28 = vector.broadcast %c10_i32 : i32 to vector<2x16x8xi32>
    %29 = arith.cmpi slt, %27, %28 : vector<2x16x8xi32>
    %cst_12 = arith.constant 0.000000e+00 : f32
    %30 = vector.broadcast %cst_12 : f32 to vector<2x16x8xf32>
    %31 = arith.select %29, %26, %30 : vector<2x16x8xi1>, vector<2x16x8xf32>
    %cst_13 = arith.constant dense<0.000000e+00> : vector<2x8x128xf32>
    %32 = tpu.matmul %31, %11, %cst_13 {dimension_numbers = #tpu.dot_dimension_numbers<[1], [1], [2], [2], [0, 0, 0, 2, 1, 2], [0], [0]>} : vector<2x16x8xf32>, vector<2x16x128xf32>, vector<2x8x128xf32> -> vector<2x8x128xf32>
    %cst_14 = arith.constant dense<0.000000e+00> : vector<2x8xf32>
    %33 = vector.multi_reduction <add>, %31, %cst_14 [1] : vector<2x16x8xf32> to vector<2x8xf32>
    %34 = vector.shape_cast %33 : vector<2x8xf32> to vector<2x8x1xf32>
    %35 = vector.shape_cast %3 : vector<8x128xf32> to vector<1x8x128xf32>
    %36 = vector.broadcast %34 : vector<2x8x1xf32> to vector<2x8x128xf32>
    %37 = vector.broadcast %35 : vector<1x8x128xf32> to vector<2x8x128xf32>
    %38 = arith.mulf %36, %37 : vector<2x8x128xf32>
    %39 = arith.subf %32, %38 : vector<2x8x128xf32>
    %40 = arith.mulf %39, %39 : vector<2x8x128xf32>
    %cst_15 = arith.constant dense<0.000000e+00> : vector<2x8xf32>
    %41 = vector.multi_reduction <add>, %40, %cst_15 [2] : vector<2x8x128xf32> to vector<2x8xf32>
    %42 = vector.shape_cast %41 : vector<2x8xf32> to vector<2x8x1xf32>
    %cst_16 = arith.constant 1.000000e-24 : f32
    %43 = vector.broadcast %cst_16 : f32 to vector<2x8x1xf32>
    %44 = arith.maximumf %42, %43 : vector<2x8x1xf32>
    %45 = math.rsqrt %44 : vector<2x8x1xf32>
    %46 = arith.mulf %42, %45 : vector<2x8x1xf32>
    %47 = arith.mulf %46, %45 : vector<2x8x1xf32>
    %cst_17 = arith.constant dense<0.000000e+00> : vector<2x1xf32>
    %48 = vector.multi_reduction <add>, %47, %cst_17 [1] : vector<2x8x1xf32> to vector<2x1xf32>
    %49 = vector.shape_cast %48 : vector<2x1xf32> to vector<2x1x1xf32>
    %cst_18 = arith.constant 1.000000e-24 : f32
    %50 = vector.broadcast %cst_18 : f32 to vector<2x1x1xf32>
    %51 = arith.maximumf %49, %50 : vector<2x1x1xf32>
    %52 = math.rsqrt %51 : vector<2x1x1xf32>
    %53 = vector.broadcast %52 : vector<2x1x1xf32> to vector<2x8x1xf32>
    %54 = arith.mulf %45, %53 : vector<2x8x1xf32>
    %55 = vector.broadcast %54 : vector<2x8x1xf32> to vector<2x8x128xf32>
    %56 = arith.mulf %39, %55 : vector<2x8x128xf32>
    %c0_19 = arith.constant 0 : index
    %c0_20 = arith.constant 0 : index
    %c0_21 = arith.constant 0 : index
    %57 = vector.load %arg5[%c0_19, %c0_20, %c0_21] : memref<2x8x128xf32, #tpu.memory_space<vmem>>, vector<2x8x128xf32>
    tpu.vector_store %arg5[%c0_19, %c0_20, %c0_21], %56 {strides = array<i32>} : memref<2x8x128xf32, #tpu.memory_space<vmem>>, vector<2x8x128xf32>,
    return
  }
  func.func @transform_0(%arg0: i32) -> (i32, i32, i32) {
    %c0_i32 = arith.constant 0 : i32
    %c0_i32_0 = arith.constant 0 : i32
    %c0_i32_1 = arith.constant 0 : i32
    return %arg0, %c0_i32, %c0_i32_0 : i32, i32, i32
  }
  func.func @transform_1(%arg0: i32) -> (i32, i32) {
    %c0_i32 = arith.constant 0 : i32
    %c0_i32_0 = arith.constant 0 : i32
    %c0_i32_1 = arith.constant 0 : i32
    return %c0_i32, %c0_i32_0 : i32, i32
  }
  func.func @transform_2(%arg0: i32) -> (i32, i32) {
    %c0_i32 = arith.constant 0 : i32
    %c0_i32_0 = arith.constant 0 : i32
    %c0_i32_1 = arith.constant 0 : i32
    return %c0_i32, %c0_i32_0 : i32, i32
  }
  func.func @transform_3(%arg0: i32) -> (i32, i32) {
    %c0_i32 = arith.constant 0 : i32
    %c0_i32_0 = arith.constant 0 : i32
    %c0_i32_1 = arith.constant 0 : i32
    return %c0_i32, %c0_i32_0 : i32, i32
  }
  func.func @transform_4(%arg0: i32) -> (i32, i32, i32) {
    %c0_i32 = arith.constant 0 : i32
    %c0_i32_0 = arith.constant 0 : i32
    %c0_i32_1 = arith.constant 0 : i32
    return %arg0, %c0_i32, %c0_i32_0 : i32, i32, i32
  }
}

</mosaic_0001>

<bundles_post_ra>
// kernel: tpu_custom_call.1
= control target key start
LH: loop header
LB: loop body
LE: loop exit
PB: predicated region body
PF: predicated region fallthrough
CT: control target
= control target key end

     0   :  { %s1204_s0 = inlined_call_operand.hbm [shape: f32[4,16,128], index: 0, kind: input, shape index: {}]   ;;  %s1205_s1 = inlined_call_operand.hbm [shape: f32[8,128], index: 1, kind: input, shape index: {}]   ;;  %s1206_s2 = inlined_call_operand.vmem [shape: f32[1,8], index: 2, kind: input, shape index: {}]   ;;  %s1207_s3 = inlined_call_operand.hbm [shape: f32[8,128], index: 3, kind: input, shape index: {}]   ;;  %s1208_s4 = inlined_call_operand.hbm [shape: f32[4,8,128], index: 4, kind: output, shape index: {}]  }
   0x1   :  { %1209 = sst [smem:[#allocation12_spill]] %s1205_s1 }
   0x2   :  { %9 = vsyncpa [#allocation3], 0 }
   0x3   :  { %11 = vsyncpa [#allocation3 + $0x1], 0 }
   0x4   :  { %12 = vsyncpa [#allocation6], 0 }
   0x5   :  { %13 = vsyncpa [#allocation4], 0 }
   0x6   :  { %15 = vsyncpa [#allocation4 + $0x1], 0  ;;  %s1033_s15 = smov 0   ;;  %s1035_s16 = smov 0  }
   0x7   :  { %s1037_s17 = smov 0   ;;  %s1039_s18 = smov 0  }
   0x8 LB: > { %s1054_s19 = sadd.s32 4294967295, %s1000_s18   ;;  %s712_s20 = sadd.s32 4294967294, %s1000_s18   ;;  %s1000_s18 = sphi %s1039_s18, %s1221_s18   ;;  %s996_s17 = sphi %s1037_s17, %s1220_s17   ;;  %s992_s16 = sphi %s1035_s16, %s1219_s16   ;;  %s988_s15 = sphi %s1033_s15, %s1218_s15  }
   0x9   : > { %s1058_s21 = sadd.s32 1, %s1000_s18   ;;  %s28_s22 = sadd.s32 1, %s996_s17 }
   0xa   : > { %s25_s23 = ssub.s32 %s1000_s18, %s1058_s21  ;;  %p35_p0 = scmp.ne.s32.totalorder %s996_s17, %s992_s16 }
   0xb   : > { %p26_p1 = scmp.eq.s32.totalorder %s25_s23, 0  ;;  %p36_p2 = scmp.eq.s32.totalorder %s1000_s18, 0 }
   0xc   : > { %p41_p3 = scmp.ne.s32.totalorder %s992_s16, %s988_s15  ;;  %p42_p4 = scmp.eq.s32.totalorder %s1054_s19, 0 }
   0xd   : > { %s1070_s24 = scalar_select %p26_p1, %s996_s17, %s28_s22  }
   0xe   : > { %p1072_p5 = por %p36_p2, %p35_p0  ;;  %p1078_p6 = por %p42_p4, %p41_p3 }
   0xf   : > { %p128_p7 = scmp.eq.s32.totalorder %s1054_s19, 1  ;;  %p134_p8 = scmp.eq.s32.totalorder %s712_s20, 1 }
  0x10   : > { %p713_p9 = scmp.ge.s32.totalorder %s1000_s18, 1  ;;  %p141_p10 = scmp.lt.s32.totalorder %s1000_s18, 3 }
  0x11   : > { %p1085_p11 = por %p128_p7, %p35_p0  ;;  %p1089_p12 = por %p134_p8, %p41_p3 }
  0x12   : > { %p1093_p13 = pnand %p713_p9, %p141_p10  ;;  %s1215_s1 = sld [smem:[#allocation12_spill]] }
  0x13   : > { %s1002_s7 = smov [#allocation5]   ;;  %p766_p3 = scmp.lt.s32.totalorder %s1000_s18, 2 }
  0x14   : > { %p749_p1 = pneg %p1093_p13  ;;  %s155_s8 = sshll.u32 %s1002_s7, 4  ;;  %s156_s8 = int_to_ptr.vmem [resolvable:$true] %s155_s8 }
  0x15   : > { %s168_s11 = sshll.u32 %s1207_s3, 4  ;;  %p1111_p7 = pnand %p766_p3, %p1072_p5  ;;  %s169_s11 = int_to_ptr.hbm [resolvable:$true] %s168_s11 }
  0x16   : > { %p750_p2 = pnand %p749_p1, %p42_p4  ;;  %s1003_s13 = smov [#allocation7]  }
  0x17   : > { %s170_s14 = sshll.u32 %s1003_s13, 4  ;;  %s181_s20 = sand.u32 1, %s996_s17   ;;  %s171_s14 = int_to_ptr.vmem [resolvable:$true] %s170_s14 }
  0x18   : > { %s153_s6 = sshll.u32 %s1215_s1, 4  ;;  %s717_s22 = sshll.u32 %s181_s20, 5  ;;  %s154_s6 = int_to_ptr.hbm [resolvable:$true] %s153_s6 }
  0x19   : > { %752 = dma.hbm_to_vmem [thread:$0]  (!%p750_p2), %s154_s6, 128, %s156_s8, [#allocation6]  }
  0x1a   : > { %755 = dma.hbm_to_vmem [thread:$0]  (!%p750_p2), %s169_s11, 128, %s171_s14, [#allocation6]  }
  0x1b   : > { %s734_s23 = sshll.u32 %s1000_s18, 5  ;;  %s185_s9 = scalar_lea.vmem [#allocation2], %s717_s22 }
  0x1c   : > { %s191_s7 = scalar_lea.hbm %s1204_s0, %s734_s23  ;;  %s194_s10 = sshll.u32 %s185_s9, 4  ;;  %s195_s10 = int_to_ptr.vmem [resolvable:$true] %s194_s10 }
  0x1d   : > { %s192_s6 = sshll.u32 %s191_s7, 4  ;;  %s182_s25 = scalar_lea.sflag [#allocation3], %s181_s20  ;;  %s193_s6 = int_to_ptr.hbm [resolvable:$true] %s192_s6 }
  0x1e   : > { %s900_s8 = sshra.s32 %s193_s6, 4  ;;  %p904_p8 = pneg %p1111_p7  ;;  %s901_s8 = int_to_ptr.hbm [resolvable:$true] %s900_s8 }
  0x1f   : > { %s902_s1 = scalar_lea.hbm %s901_s8, 32  ;;  %s907_s14 = scalar_lea.hbm %s1204_s0, 64 }
  0x20   : > { %p903_p5 = scmp.ne.s32.totalorder %s901_s8, %s902_s1  ;;  %p908_p1 = scmp.lt.s32.totalorder %s901_s8, %s1204_s0 }
  0x21   : > { %p909_p2 = scmp.lt.s32.totalorder %s907_s14, %s902_s1 }
  0x22   : > { %p905_p9 = pnand %p904_p8, %p903_p5 }
  0x23   : > { %p910_p3 = por %p909_p2, %p908_p1 }
  0x24   : > { %p906_p10 = pneg %p905_p9 }
  0x26   : > { %p911_p0 = pnand %p910_p3, %p906_p10 }
  0x28   : > { %914 = shalt.err (!%p911_p0)
}
  0x29   : > { %s1004_s20 = smov 128   ;;  %s1005_s22 = smov 8  }
  0x2a   : > { %759 = dma.hbm_to_vmem [thread:$0]  (!%p1111_p7), %s193_s6, 512, %s195_s10, %s182_s25, %s1004_s20, %s1004_s20, %s1005_s22  }
  0x2b   : > { %206 = sbr.rel (%p1093_p13) target bundleno = 951 (0x3b7), region = 36  ;;  %s1133_s5 = sand.u32 (!%p1093_p13), 1, %s992_s16  }
  0x2c   : > { %s722_s7 = sshll.u32 (!%p1093_p13), %s1133_s5, 5  ;;  %s209_s9 = scalar_lea.sflag (!%p1093_p13), [#allocation3], %s1133_s5 }
  0x2d   : > { %s212_s1 = scalar_lea.vmem (!%p1093_p13), [#allocation2], %s722_s7 }
  0x30   : > { %975 = dma.done.wait (%p1078_p6), %s209_s9, 512  }
  0x31   : > { %977 = vsyncadd (%p1078_p6), %s209_s9, 4294966784 }
  0x32   : > { %979 = dma.done.wait (%p42_p4), [#allocation6], 256  }
  0x33   : > { %981 = vsyncadd (%p42_p4), [#allocation6], 4294967040  ;;  %v254_v0 = vld [vmem:[#allocation5] sm:$0xff]  ;;  %v251_v2 = vld [vmem:[%s212_s1 + $0x8] sm:$0xff]  ;;  %vm333_vm6 = vcmask 64512   ;;  %vm419_vm8 = vcmask 130048  }
  0x34   : > { %v250_v1 = vld [vmem:[%s212_s1] sm:$0xff]  ;;  %319 = vmatpush.xpose.msra.mxu0 %v254_v0  ;;  %736 = vmatpush.xpose.msra.mxu3 %v254_v0  ;;  %v258_v4 = vmul.f32 %v251_v2, %v251_v2  ;;  %v252_v5 = vld [vmem:[%s212_s1 + $0x10] sm:$0xff]  ;;  %v253_v6 = vld [vmem:[%s212_s1 + $0x18] sm:$0xff]  ;;  %s725_s12 = sshll.u32 %s1133_s5, 4  ;;  %s735_s10 = sshll.u32 %s1054_s19, 4 }
  0x35   : > { %v257_v3 = vmul.f32 %v250_v1, %v250_v1  ;;  %v259_v7 = vmul.f32 %v252_v5, %v252_v5  ;;  %v260_v8 = vmul.f32 %v253_v6, %v253_v6  ;;  %v811_v43 = vld [vmem:[%s1206_s2] ss:$0 sm:$0xff]  ;;  %s616_s8 = scalar_lea.hbm %s1208_s4, %s735_s10  ;;  %s247_s11 = scalar_lea.vmem [#allocation8], %s725_s12 }
  0x36   : > { %s617_s19 = sshll.u32 %s247_s11, 4  ;;  %s619_s13 = sshll.u32 %s616_s8, 4  ;;  %s618_s19 = int_to_ptr.vmem [resolvable:$true] %s617_s19  ;;  %s620_s13 = int_to_ptr.hbm [resolvable:$true] %s619_s13 }
  0x37   : > { %v261_v9 = vadd.f32 %v258_v4, %v257_v3  ;;  %v268_v10 = vadd.f32 %v260_v8, %v259_v7  ;;  %s605_s14 = scalar_lea.sflag [#allocation4], %s1133_s5  ;;  %s944_s30 = sshra.s32 %s620_s13, 4  ;;  %s945_s30 = int_to_ptr.hbm [resolvable:$true] %s944_s30 }
  0x38   : > { %s946_s23 = scalar_lea.hbm %s945_s30, 16  ;;  %s950_s7 = scalar_lea.hbm %s1208_s4, 32 }
  0x39   : > { %v262_v11 = vrot.slane %v261_v9, 4  ;;  %v269_v12 = vrot.slane %v268_v10, 4  ;;  %p947_p4 = scmp.ne.s32.totalorder %s945_s30, %s946_s23  ;;  %p951_p0 = scmp.lt.s32.totalorder %s945_s30, %s1208_s4 }
  0x3a   : > { %p952_p7 = scmp.lt.s32.totalorder %s950_s7, %s946_s23 }
  0x3b   : > { %v263_v13 = vadd.f32 %v262_v11, %v261_v9  ;;  %v270_v14 = vadd.f32 %v269_v12, %v268_v10  ;;  %v378_v12 = vlaneseq  ;;  %p948_p6 = pnand %p947_p4, %p1085_p11 }
  0x3c   : > { %p953_p5 = por %p952_p7, %p951_p0 }
  0x3d   : > { %v264_v15 = vrot.slane %v263_v13, 2  ;;  %v271_v16 = vrot.slane %v270_v14, 2  ;;  %p949_p13 = pneg %p948_p6 }
  0x3f   : > { %v265_v17 = vadd.f32 %v264_v15, %v263_v13  ;;  %v272_v18 = vadd.f32 %v271_v16, %v270_v14  ;;  %v379_v13 = vshrl.u32 %v378_v12, 7  ;;  %p954_p8 = pnand %p953_p5, %p949_p13 }
  0x41   : > { %v266_v19 = vrot.slane %v265_v17, 1  ;;  %v273_v20 = vrot.slane %v272_v18, 1  ;;  %809 = vset.pattern.permute.xlu1 %v379_v13 }
  0x43   : > { %v267_v21 = vadd.f32 %v266_v19, %v265_v17  ;;  %v274_v22 = vadd.f32 %v273_v20, %v272_v18  ;;  %v380_v19 = vadd.s32 8, %v379_v13 }
  0x45   : > { %v275_v23 = vmax.f32 %v267_v21, 1e-24  ;;  %v276_v24 = vmax.f32 %v274_v22, 1e-24  ;;  %vm382_vm7 = vcmp.lt.s32.totalorder %v380_v19, 10 }
  0x47   : > { %812 = vrsqrt.f32 %v275_v23  ;;  %vm283_vm0 = vweird.f32 %v275_v23  ;;  %vm293_vm2 = vweird.f32 %v276_v24 }
  0x48   : > { %814 = vrsqrt.f32 %v276_v24 }
  0x4d   : > { %v813_v25 = vpop.eup %812 }
  0x4e   : > { %v815_v26 = vpop.eup %814  ;;  %v278_v27 = vmul.f32 %v813_v25, %v275_v23  ;;  %vm284_vm1 = vweird.f32 %v813_v25 }
  0x4f   : > { %v288_v28 = vmul.f32 %v815_v26, %v276_v24  ;;  %vm294_vm3 = vweird.f32 %v815_v26  ;;  %vm285_vm4 = vmor %vm283_vm0, %vm284_vm1 }
  0x50   : > { %v279_v29 = vmul.f32 %v813_v25, %v278_v27  ;;  %vm295_vm5 = vmor %vm293_vm2, %vm294_vm3 }
  0x51   : > { %v289_v30 = vmul.f32 %v815_v26, %v288_v28 }
  0x52   : > { %v280_v31 = vmul.f32 0.5, %v279_v29 }
  0x53   : > { %v290_v32 = vmul.f32 0.5, %v289_v30 }
  0x54   : > { %v281_v33 = vsub.f32 1.5, %v280_v31 }
  0x55   : > { %v291_v34 = vsub.f32 1.5, %v290_v32 }
  0x56   : > { %v282_v35 = vmul.f32 %v813_v25, %v281_v33 }
  0x57   : > { %v292_v36 = vmul.f32 %v815_v26, %v291_v34 }
  0x58   : > { %v286_v37 = vsel %vm285_vm4, %v813_v25, %v282_v35 }
  0x59   : > { %v297_v38 = vmul.f32 %v286_v37, %v250_v1  ;;  %v296_v39 = vsel %vm295_vm5, %v815_v26, %v292_v36  ;;  %v298_v40 = vmul.f32 %v286_v37, %v251_v2 }
  0x5a   : > { %v299_v41 = vmul.f32 %v296_v39, %v252_v5  ;;  %v300_v42 = vmul.f32 %v296_v39, %v253_v6 }
  0x5b   : > { %320 = vmatmul.f32.vlgmr.msra.gmra.mxu0 %v297_v38  ;;  %437 = vmatpush.msra.mxu1 %v298_v40 }
  0x5c   : > { %326 = vmatmul.f32.vlgmr.msra.gmra.mxu3 %v299_v41  ;;  %492 = vmatpush.msra.mxu2 %v300_v42 }
  0x5d   : > { %438 = vmatpush.msra.mxu1 %v297_v38 }
  0x5e   : > { %493 = vmatpush.msra.mxu2 %v299_v41 }
  0x63   : > { %323 = vmatmul.f32.gmra.mxu0 %v298_v40 }
  0x64   : > { %329 = vmatmul.f32.gmra.mxu3 %v300_v42 }
  0xd8   : > { %v321_v44 = vpop.f32.mrf.mxu0 }
  0xd9   : > { %v322_v45 = vadd.f32 %v811_v43, %v321_v44 }
  0xdb   : > { %v334_v46 = vsel %vm333_vm6, %v322_v45, -inf }
  0xdc   : > { %335 = vmax.xlane.f32.xlu1 %v334_v46 }
  0xdf   : > { %v327_v47 = vpop.f32.mrf.mxu3 }
  0xe0   : > { %v328_v48 = vadd.f32 %v811_v43, %v327_v47  ;;  %v324_v49 = vpop.f32.mrf.mxu0 }
  0xe1   : > { %v325_v50 = vadd.f32 %v811_v43, %v324_v49 }
  0xe2   : > { %v340_v51 = vsel %vm333_vm6, %v328_v48, -inf }
  0xe3   : > { %341 = vmax.xlane.f32.xlu0 %v340_v51  ;;  %v337_v52 = vsel %vm333_vm6, %v325_v50, -inf }
  0xe4   : > { %338 = vmax.xlane.f32.xlu1 %v337_v52 }
  0xe7   : > { %v330_v53 = vpop.f32.mrf.mxu3 }
  0xe8   : > { %v331_v54 = vadd.f32 %v811_v43, %v330_v53 }
  0xea   : > { %v343_v55 = vsel %vm333_vm6, %v331_v54, -inf }
  0xeb   : > { %344 = vmax.xlane.f32.xlu0 %v343_v55 }
 0x14f   : > { %v336_v56 = vpop.xlane.xlu1 %335 }
 0x150   : > { %v346_v57 = vsub.f32 %v322_v45, %v336_v56 }
 0x152   : > { %v350_v58 = vmul.f32 1.442695, %v346_v57 }
 0x154   : > { %816 = vpow2.f32 %v350_v58 }
 0x156   : > { %v342_v59 = vpop.xlane.xlu0 %341 }
 0x157   : > { %v348_v60 = vsub.f32 %v328_v48, %v342_v59  ;;  %v339_v61 = vpop.xlane.xlu1 %338 }
 0x158   : > { %v347_v62 = vsub.f32 %v325_v50, %v339_v61  ;;  %v256_v50 = vld [vmem:[#allocation7] sm:$0xff] }
 0x159   : > { %v354_v63 = vmul.f32 1.442695, %v348_v60 }
 0x15a   : > { %v817_v0 = vpop.eup %816  ;;  %v352_v1 = vmul.f32 1.442695, %v347_v62 }
 0x15b   : > { %818 = vpow2.f32 %v354_v63  ;;  %v358_v2 = vsel %vm333_vm6, %v817_v0, 0.0 }
 0x15c   : > { %820 = vpow2.f32 %v352_v1  ;;  %359 = vadd.xlane.f32.xlu0 %v358_v2 }
 0x15e   : > { %v345_v3 = vpop.xlane.xlu0 %344 }
 0x15f   : > { %v349_v4 = vsub.f32 %v331_v54, %v345_v3 }
 0x161   : > { %v819_v5 = vpop.eup %818  ;;  %v356_v6 = vmul.f32 1.442695, %v349_v4 }
 0x162   : > { %v821_v7 = vpop.eup %820  ;;  %v364_v8 = vsel %vm333_vm6, %v819_v5, 0.0 }
 0x163   : > { %822 = vpow2.f32 %v356_v6  ;;  %365 = vadd.xlane.f32.xlu2 %v364_v8  ;;  %v361_v9 = vsel %vm333_vm6, %v821_v7, 0.0 }
 0x164   : > { %362 = vadd.xlane.f32.xlu1 %v361_v9 }
 0x169   : > { %v823_v10 = vpop.eup %822 }
 0x16a   : > { %v367_v11 = vsel %vm333_vm6, %v823_v10, 0.0 }
 0x16b   : > { %368 = vadd.xlane.f32.xlu2 %v367_v11 }
 0x1cf   : > { %v360_v14 = vpop.xlane.xlu0 %359 }
 0x1d0   : > { %824 = vrcp.f32 %v360_v14 }
 0x1d6   : > { %v825_v15 = vpop.eup %824  ;;  %v366_v16 = vpop.xlane.xlu2 %365 }
 0x1d7   : > { %826 = vrcp.f32 %v366_v16  ;;  %v363_v17 = vpop.xlane.xlu1 %362  ;;  %v374_v18 = vmul.f32 %v825_v15, %v817_v0 }
 0x1d8   : > { %828 = vrcp.f32 %v363_v17 }
 0x1d9   : > { %387 = vxpose.xlu0.b32.start [1/2] (short) (narrow) %v374_v18, 8  ;;  %v498_v26 = vsel %vm333_vm6, %v374_v18, 0.0 }
 0x1dd   : > { %v827_v20 = vpop.eup %826 }
 0x1de   : > { %v829_v21 = vpop.eup %828  ;;  %v369_v22 = vpop.xlane.xlu2 %368  ;;  %v376_v23 = vmul.f32 %v827_v20, %v819_v5 }
 0x1df   : > { %830 = vrcp.f32 %v369_v22  ;;  %v375_v24 = vmul.f32 %v829_v21, %v821_v7 }
 0x1e0   : > { %443 = vxpose.xlu2.b32.start [1/2] (short) (narrow) %v376_v23, 8  ;;  %v507_v34 = vsel %vm333_vm6, %v376_v23, 0.0 }
 0x1e1   : > { %v384_v25 = vsel %vm382_vm7, %v375_v24, 0.0 }
 0x1e2   : > { %388 = vxpose.xlu0.b32.end [2/2] (short) (narrow) %v384_v25, 8  ;;  %v499_v27 = vsel %vm333_vm6, %v384_v25, 0.0 }
 0x1e3   : > { %v500_v28 = vadd.f32 %v499_v27, %v498_v26 }
 0x1e5   : > { %v831_v29 = vpop.eup %830  ;;  %v501_v30 = vrot.slane %v500_v28, 4 }
 0x1e6   : > { %v377_v31 = vmul.f32 %v831_v29, %v823_v10 }
 0x1e7   : > { %v502_v32 = vadd.f32 %v501_v30, %v500_v28 }
 0x1e8   : > { %v386_v33 = vsel %vm382_vm7, %v377_v31, 0.0 }
 0x1e9   : > { %v503_v35 = vrot.slane %v502_v32, 2  ;;  %444 = vxpose.xlu2.b32.end [2/2] (short) (narrow) %v386_v33, 8  ;;  %v508_v36 = vsel %vm333_vm6, %v386_v33, 0.0 }
 0x1ea   : > { %v509_v37 = vadd.f32 %v508_v36, %v507_v34 }
 0x1eb   : > { %v504_v38 = vadd.f32 %v503_v35, %v502_v32 }
 0x1ec   : > { %v510_v39 = vrot.slane %v509_v37, 4 }
 0x1ed   : > { %v505_v40 = vrot.slane %v504_v38, 1 }
 0x1ee   : > { %v511_v41 = vadd.f32 %v510_v39, %v509_v37 }
 0x1ef   : > { %v506_v42 = vadd.f32 %v505_v40, %v504_v38 }
 0x1f0   : > { %v512_v43 = vrot.slane %v511_v41, 2 }
 0x1f1   : > { %520 = vperm.xlu1 %809, %v506_v42  }
 0x1f2   : > { %v513_v44 = vadd.f32 %v512_v43, %v511_v41 }
 0x1f4   : > { %v514_v45 = vrot.slane %v513_v44, 1 }
 0x1f6   : > { %v515_v46 = vadd.f32 %v514_v45, %v513_v44 }
 0x1f9   : > { %526 = vperm.xlu1 %809, %v515_v46  }
 0x249   : > { %810 = vset.pattern.permute.xlu0 %v379_v13 }
 0x263   : > { %v521_v49 = vpop.permute.xlu1 %520 }
 0x264   : > { %v528_v52 = vmul.f32 %v521_v49, %v256_v50 }
 0x26b   : > { %v527_v51 = vpop.permute.xlu1 %526 }
 0x26c   : > { %v529_v54 = vmul.f32 %v527_v51, %v256_v50 }
 0x27a   : > { %v459_v47 = vpop.trf.xlu2 }
 0x27b   : > { %727 = vmatmul.msk.f32.vlgmr.msra.gmra.mxu2 %vm419_vm8, %v459_v47 }
 0x27e   : > { %v403_v48 = vpop.trf.xlu0 }
 0x27f   : > { %726 = vmatmul.msk.f32.vlgmr.msra.gmra.mxu1 %vm419_vm8, %v403_v48 }
 0x2fc   : > { %v440_v53 = vpop.f32.mrf.mxu1 }
 0x2fd   : > { %v1160_v55 = vsub.f32 %v440_v53, %v528_v52 }
 0x2fe   : > { %v495_v56 = vpop.f32.mrf.mxu2 }
 0x2ff   : > { %v1162_v57 = vsub.f32 %v495_v56, %v529_v54  ;;  %v532_v58 = vmul.f32 %v1160_v55, %v1160_v55 }
 0x301   : > { %534 = vadd.xlane.f32.xlu1 %v532_v58  ;;  %v533_v59 = vmul.f32 %v1162_v57, %v1162_v57 }
 0x303   : > { %536 = vadd.xlane.f32.xlu2 %v533_v59 }
 0x374   : > { %v535_v60 = vpop.xlane.xlu1 %534 }
 0x375   : > { %v538_v61 = vmax.f32 %v535_v60, 1e-24 }
 0x376   : > { %v537_v62 = vpop.xlane.xlu2 %536 }
 0x377   : > { %832 = vrsqrt.f32 %v538_v61  ;;  %v539_v63 = vmax.f32 %v537_v62, 1e-24  ;;  %vm546_vm10 = vweird.f32 %v538_v61 }
 0x379   : > { %834 = vrsqrt.f32 %v539_v63  ;;  %vm556_vm13 = vweird.f32 %v539_v63 }
 0x37d   : > { %v833_v0 = vpop.eup %832 }
 0x37e   : > { %v541_v1 = vmul.f32 %v833_v0, %v538_v61  ;;  %vm547_vm9 = vweird.f32 %v833_v0 }
 0x37f   : > { %v835_v2 = vpop.eup %834  ;;  %vm548_vm12 = vmor %vm546_vm10, %vm547_vm9 }
 0x380   : > { %v542_v3 = vmul.f32 %v833_v0, %v541_v1  ;;  %v551_v4 = vmul.f32 %v835_v2, %v539_v63  ;;  %vm557_vm11 = vweird.f32 %v835_v2 }
 0x381   : > { %vm558_vm14 = vmor %vm556_vm13, %vm557_vm11 }
 0x382   : > { %v543_v5 = vmul.f32 0.5, %v542_v3  ;;  %v552_v6 = vmul.f32 %v835_v2, %v551_v4 }
 0x384   : > { %v544_v7 = vsub.f32 1.5, %v543_v5  ;;  %v553_v8 = vmul.f32 0.5, %v552_v6 }
 0x386   : > { %v545_v9 = vmul.f32 %v833_v0, %v544_v7  ;;  %v554_v10 = vsub.f32 1.5, %v553_v8 }
 0x388   : > { %v549_v11 = vsel %vm548_vm12, %v833_v0, %v545_v9  ;;  %v555_v12 = vmul.f32 %v835_v2, %v554_v10 }
 0x389   : > { %v560_v13 = vmul.f32 %v549_v11, %v535_v60 }
 0x38a   : > { %v559_v14 = vsel %vm558_vm14, %v835_v2, %v555_v12 }
 0x38b   : > { %v562_v15 = vmul.f32 %v560_v13, %v549_v11  ;;  %v561_v16 = vmul.f32 %v559_v14, %v537_v62 }
 0x38d   : > { %v564_v17 = vrot.slane %v562_v15, 4  ;;  %v563_v18 = vmul.f32 %v561_v16, %v559_v14 }
 0x38f   : > { %v565_v19 = vadd.f32 %v564_v17, %v562_v15  ;;  %v570_v20 = vrot.slane %v563_v18, 4 }
 0x391   : > { %v566_v21 = vrot.slane %v565_v19, 2  ;;  %v571_v22 = vadd.f32 %v570_v20, %v563_v18 }
 0x393   : > { %v567_v23 = vadd.f32 %v566_v21, %v565_v19  ;;  %v572_v24 = vrot.slane %v571_v22, 2 }
 0x395   : > { %v568_v25 = vrot.slane %v567_v23, 1  ;;  %v573_v26 = vadd.f32 %v572_v24, %v571_v22 }
 0x397   : > { %v569_v27 = vadd.f32 %v568_v25, %v567_v23  ;;  %v574_v28 = vrot.slane %v573_v26, 1 }
 0x399   : > { %v576_v29 = vmax.f32 %v569_v27, 1e-24  ;;  %v575_v30 = vadd.f32 %v574_v28, %v573_v26 }
 0x39b   : > { %836 = vrsqrt.f32 %v576_v29  ;;  %v577_v31 = vmax.f32 %v575_v30, 1e-24  ;;  %vm584_vm0 = vweird.f32 %v576_v29 }
 0x39d   : > { %838 = vrsqrt.f32 %v577_v31  ;;  %vm594_vm3 = vweird.f32 %v577_v31 }
 0x3a1   : > { %v837_v32 = vpop.eup %836 }
 0x3a2   : > { %v579_v33 = vmul.f32 %v837_v32, %v576_v29  ;;  %vm585_vm15 = vweird.f32 %v837_v32 }
 0x3a3   : > { %v839_v34 = vpop.eup %838  ;;  %vm586_vm2 = vmor %vm584_vm0, %vm585_vm15 }
 0x3a4   : > { %v580_v35 = vmul.f32 %v837_v32, %v579_v33  ;;  %v589_v36 = vmul.f32 %v839_v34, %v577_v31  ;;  %vm595_vm1 = vweird.f32 %v839_v34 }
 0x3a5   : > { %vm596_vm4 = vmor %vm594_vm3, %vm595_vm1 }
 0x3a6   : > { %v581_v37 = vmul.f32 0.5, %v580_v35  ;;  %v590_v38 = vmul.f32 %v839_v34, %v589_v36 }
 0x3a8   : > { %v582_v39 = vsub.f32 1.5, %v581_v37  ;;  %v591_v40 = vmul.f32 0.5, %v590_v38 }
 0x3aa   : > { %v583_v41 = vmul.f32 %v837_v32, %v582_v39  ;;  %v592_v42 = vsub.f32 1.5, %v591_v40 }
 0x3ac   : > { %v587_v43 = vsel %vm586_vm2, %v837_v32, %v583_v41  ;;  %v593_v44 = vmul.f32 %v839_v34, %v592_v42 }
 0x3ad   : > { %v598_v45 = vmul.f32 %v587_v43, %v549_v11 }
 0x3ae   : > { %v597_v46 = vsel %vm596_vm4, %v839_v34, %v593_v44 }
 0x3af   : > { %v600_v47 = vmul.f32 %v598_v45, %v1160_v55  ;;  %v599_v48 = vmul.f32 %v597_v46, %v559_v14 }
 0x3b1   : > { %602 = vst [vmem:[%s247_s11] sm:$0xff] %v600_v47  ;;  %v601_v49 = vmul.f32 %v599_v48, %v1162_v57 }
 0x3b3   : > { %603 = vst [vmem:[%s247_s11 + $0x8] sm:$0xff] %v601_v49 }
 0x3b4   : > { %957 = shalt.err (!%p954_p8)
}
 0x3b5   : > { %s1006_s5 = smov 128   ;;  %s1007_s26 = smov 8  }
 0x3b6   : > { %747 = dma.vmem_to_hbm [thread:$0]  (%p1085_p11), %s618_s19, 256, %s620_s13, %s605_s14, %s1006_s5, %s1006_s5, %s1007_s26  }
 0x3b7 PF: > { %s634_s29 = sand.u32 1, %s988_s15   ;;  %p1217_p9 = scmp.ge.s32.totalorder %s1000_s18, 2 }
 0x3b8   : > { %s635_s12 = scalar_lea.sflag [#allocation4], %s634_s29 }
 0x3b9   : > { %p761_p10 = pnand %p1217_p9, %p1089_p12 }
 0x3bb   : > { %p762_p1 = pneg %p761_p10 }
 0x3bd   : > { %983 = dma.done.wait (%p762_p1), %s635_s12, 256  }
 0x3be   : > { %985 = vsyncadd (%p762_p1), %s635_s12, 4294967040  ;;  %p18_p2 = scmp.ge.s32.totalorder %s1058_s21, 4   ;;  %s1218_s15 = smov %s992_s16 }
 0x3bf   : > { %s1219_s16 = smov %s996_s17  ;;  %s1220_s17 = smov %s1070_s24 }
 0x3c0   : > { %s1221_s18 = smov %s1058_s21  ;;  %20 = sbr.rel (!%p18_p2) target bundleno = 8 (0x8), region = 89 }
 0x3c5   :  { %641 = vsyncpa [#allocation3], 1 }
 0x3c6   :  { %643 = vsyncpa [#allocation3 + $0x1], 1 }
 0x3c7   :  { %644 = vsyncpa [#allocation6], 1 }
 0x3c8   :  { %645 = vsyncpa [#allocation4], 1 }
 0x3c9   :  { %647 = vsyncpa [#allocation4 + $0x1], 1 }

</bundles_post_ra>
